<compile_context>
chip_gen: v5e
topology: v5e:2x2
jax: 0.10.0
libtpu: 0.0.40
codegen_flags: <defaults>
</compile_context>

<pallas_src>
import jax
import jax.numpy as jnp
from jax import lax
from jax.experimental import pallas as pl
from jax.experimental.pallas import tpu as pltpu


def _sage_kernel(xw_ref, adj_ref, xrow_ref, wroot_ref, b_ref, out_ref):
    """One (row-tile, batch) grid step.

    xw_ref    : (1, N, H+1)  bf16 -- [x @ W_rel^T | 1]; ones column folds the degree
    adj_ref   : (1, TM, N)   int8 -- row tile of the dense 0/1 adjacency
    xrow_ref  : (1, TM, C)   bf16 -- rows of x for the root/self term
    wroot_ref : (C, H)       bf16 -- W_root^T
    b_ref     : (1, H)       f32
    out_ref   : (1, TM, H)   f32
    """
    h = wroot_ref.shape[1]

    # int8 -> bf16 conversion is VPU work, which has slack under an MXU-bound matmul.
    adj = adj_ref[0].astype(jnp.bfloat16)                                   # (TM, N)

    # Single MXU pass over the adjacency tile yields BOTH the rel-projected
    # aggregation and the degrees, accumulated in f32.
    agg_deg = jnp.dot(adj, xw_ref[0], preferred_element_type=jnp.float32)   # (TM, H+1)
    deg = jnp.maximum(agg_deg[:, h:], 1.0)                                  # clamp(min=1)
    agg = agg_deg[:, :h] * pl.reciprocal(deg, approx=False)                 # exact recip (numerics)

    # Root/self term: bf16 operands, f32 accumulation (one MXU pass, K=C).
    root = jnp.dot(xrow_ref[0], wroot_ref[...], preferred_element_type=jnp.float32)

    out_ref[0] = (agg + root + b_ref[...]).astype(out_ref.dtype)


def _vmem_budgets():
    """Generation-aware budgets: (adj double-buffer slab budget, vmem_limit_bytes)."""
    try:
        cap = pltpu.get_tpu_info().vmem_capacity_bytes
    except Exception:
        cap = 64 * 1024 * 1024                       # conservative (v7x-sized) default
    if cap >= 128 * 1024 * 1024:                     # v5e / v6e: 128 MiB VMEM
        return 44 * 1024 * 1024, 100 * 1024 * 1024
    return 20 * 1024 * 1024, 48 * 1024 * 1024        # v7x: 64 MiB per TensorCore


def _choose_row_tile(n_nodes, slab_budget):
    """Largest row tile (multiple of 32 for int8 sublane packing, divides N) whose
    double-buffered int8 adjacency slab stays within the generation budget."""
    for tm in (2048, 1024, 512, 256, 128, 64, 32):
        if tm <= n_nodes and n_nodes % tm == 0 and 2 * tm * n_nodes <= slab_budget:
            return tm
    # Tiny / non-divisible N: full-extent block satisfies the (8,128) rule.
    return n_nodes


def node_profile_forward(x, adj, w_rel_t, b_rel, w_root_t):
    """x: [B,N,C], adj: [B,N,N] (0/1), w_rel_t/w_root_t: [C,H], b_rel: [1,H] or [H] -> [B,N,H]"""
    B, N, C = x.shape
    H = w_rel_t.shape[1]

    # Fold the rel linear into the aggregation matmul: xw = x @ W_rel^T, plus a ones
    # column so adj @ [xw | 1] yields [rel-agg | deg] in one MXU pass.
    # NOTE: this is the right trade while H + 1 <= 128 (one MXU pass regardless of width).
    xw = jnp.einsum("bnc,ch->bnh", x.astype(jnp.float32), w_rel_t.astype(jnp.float32),
                    precision=lax.Precision.HIGHEST)
    xw_aug = jnp.concatenate(
        [xw, jnp.ones((B, N, 1), jnp.float32)], axis=-1).astype(jnp.bfloat16)

    adj_i8 = adj.astype(jnp.int8)            # 0/1 adjacency: int8 halves the dominant HBM stream
    x_bf = x.astype(jnp.bfloat16)
    w_root_bf = w_root_t.astype(jnp.bfloat16)
    b_f32 = jnp.reshape(b_rel, (1, H)).astype(jnp.float32)

    slab_budget, vmem_limit = _vmem_budgets()
    tm = _choose_row_tile(N, slab_budget)
    n_tiles = N // tm
    # For very small graphs several batches could be packed per grid step to amortize
    # the ~0.35us/step overhead; omitted to keep the kernel single-path.

    grid_spec = pltpu.PrefetchScalarGridSpec(
        num_scalar_prefetch=0,
        # Row-tile axis first so v7x megacore sharding splits the larger axis even
        # when B is small (v5e/v6e single-TC are unaffected).
        grid=(n_tiles, B),
        in_specs=[
            pl.BlockSpec((1, N, H + 1), lambda i, b: (b, 0, 0)),   # [xw | 1] (bf16)
            # Adjacency row tile (int8). If a v5e trace shows exposed DMA waits here,
            # raise depth via pipeline_mode=pl.Buffered(3).
            pl.BlockSpec((1, tm, N), lambda i, b: (b, i, 0)),
            pl.BlockSpec((1, tm, C), lambda i, b: (b, i, 0)),       # x rows (root term)
            pl.BlockSpec((C, H), lambda i, b: (0, 0)),              # W_root^T (bf16)
            pl.BlockSpec((1, H), lambda i, b: (0, 0)),              # bias (f32)
        ],
        # Exact-H f32 output: no lane padding to write, no external slice pass.
        out_specs=pl.BlockSpec((1, tm, H), lambda i, b: (b, i, 0)),
    )

    return pl.pallas_call(
        _sage_kernel,
        out_shape=jax.ShapeDtypeStruct((B, N, H), jnp.float32),
        grid_spec=grid_spec,
        compiler_params=pltpu.CompilerParams(
            dimension_semantics=("parallel", "parallel"),
            vmem_limit_bytes=vmem_limit),
    )(xw_aug, adj_i8, x_bf, w_root_bf, b_f32)


def reference_forward(x, adj, w_rel_t, b_rel, w_root_t):
    """Pure-JAX f32 reference (HIGHEST precision) matching the PyTorch forward."""
    hi = lax.Precision.HIGHEST
    agg = jnp.einsum("bij,bjc->bic", adj, x, precision=hi)
    deg = jnp.maximum(jnp.sum(adj, axis=-1, keepdims=True), 1.0)
    agg = agg / deg
    rel = jnp.einsum("bnc,ch->bnh", agg, w_rel_t, precision=hi)
    root = jnp.einsum("bnc,ch->bnh", x, w_root_t, precision=hi)
    return rel + jnp.reshape(b_rel, (1, 1, -1)) + root


if __name__ == "__main__":
    # Small shapes consistent with NodeProfile(in_channels=8, hidden_channels=32)
    B, N, C_IN, HID = 2, 16, 8, 32

    key = jax.random.PRNGKey(0)
    kx, kadj, kw1, kb1, kw2 = jax.random.split(key, 5)

    x = jax.random.normal(kx, (B, N, C_IN), dtype=jnp.float32)
    adj = (jax.random.uniform(kadj, (B, N, N)) > 0.7).astype(jnp.float32)  # dense 0/1 adjacency

    # PyTorch Linear weight is [out, in]; kernel takes the transpose [in, out].
    w_rel_t = 0.1 * jax.random.normal(kw1, (C_IN, HID), dtype=jnp.float32)
    b_rel = 0.1 * jax.random.normal(kb1, (1, HID), dtype=jnp.float32)
    w_root_t = 0.1 * jax.random.normal(kw2, (C_IN, HID), dtype=jnp.float32)

    out = node_profile_forward(x, adj, w_rel_t, b_rel, w_root_t)
    out = jax.block_until_ready(out)

    ref = reference_forward(x, adj, w_rel_t, b_rel, w_root_t)

    assert out.shape == (B, N, HID)
    max_err = float(jnp.max(jnp.abs(out - ref)))
    # Kernel runs activations / adjacency through bf16 (f32 accumulation); tolerance
    # sized for bf16 rounding of ~O(0.3)-magnitude outputs.
    assert jnp.allclose(out, ref, atol=1e-2, rtol=1e-2), f"mismatch vs reference (max abs err {max_err})"

    print("KERNEL_OK")
</pallas_src>

<mosaic_0001>
module attributes {stable_mosaic.version = 11 : i64} {
  func.func @_sage_kernel(%arg0: i32, %arg1: i32, %arg2: memref<1x16x33xbf16, #tpu.memory_space<vmem>>, %arg3: memref<1x16x16xi8, #tpu.memory_space<vmem>>, %arg4: memref<1x16x8xbf16, #tpu.memory_space<vmem>>, %arg5: memref<8x32xbf16, #tpu.memory_space<vmem>>, %arg6: memref<1x32xf32, #tpu.memory_space<vmem>>, %arg7: memref<1x16x32xf32, #tpu.memory_space<vmem>>) attributes {dimension_semantics = [#tpu.dimension_semantics<parallel>, #tpu.dimension_semantics<parallel>], iteration_bounds = array<i64: 1, 2>, scalar_prefetch = 0 : i64, scratch_operands = 0 : i64, tpu.core_type = #tpu.core_type<tc>, window_params = [{transform_indices = @transform_0, window_bounds = array<i64: 1, 16, 33>}, {transform_indices = @transform_1, window_bounds = array<i64: 1, 16, 16>}, {transform_indices = @transform_2, window_bounds = array<i64: 1, 16, 8>}, {pipeline_mode = #tpu.pipeline_mode<synchronous>, transform_indices = @transform_3, window_bounds = array<i64: 8, 32>}, {pipeline_mode = #tpu.pipeline_mode<synchronous>, transform_indices = @transform_4, window_bounds = array<i64: 1, 32>}, {transform_indices = @transform_5, window_bounds = array<i64: 1, 16, 32>}]} {
    %c0 = arith.constant 0 : index
    %c0_0 = arith.constant 0 : index
    %c0_1 = arith.constant 0 : index
    %0 = vector.load %arg3[%c0, %c0_0, %c0_1] : memref<1x16x16xi8, #tpu.memory_space<vmem>>, vector<1x16x16xi8>
    %1 = vector.shape_cast %0 : vector<1x16x16xi8> to vector<16x16xi8>
    %2 = arith.sitofp %1 : vector<16x16xi8> to vector<16x16xbf16>
    %c0_2 = arith.constant 0 : index
    %c0_3 = arith.constant 0 : index
    %c0_4 = arith.constant 0 : index
    %3 = vector.load %arg2[%c0_2, %c0_3, %c0_4] : memref<1x16x33xbf16, #tpu.memory_space<vmem>>, vector<1x16x33xbf16>
    %4 = vector.shape_cast %3 : vector<1x16x33xbf16> to vector<16x33xbf16>
    %cst = arith.constant dense<0.000000e+00> : vector<16x33xf32>
    %5 = tpu.matmul %2, %4, %cst {dimension_numbers = #tpu.dot_dimension_numbers<[1], [0], [0], [1], [0, 0, 1, 1], [], []>} : vector<16x16xbf16>, vector<16x33xbf16>, vector<16x33xf32> -> vector<16x33xf32>
    %6 = vector.extract_strided_slice %5 {offsets = [0, 32], sizes = [16, 1], strides = [1, 1]} : vector<16x33xf32> to vector<16x1xf32>
    %cst_5 = arith.constant 1.000000e+00 : f32
    %7 = vector.broadcast %cst_5 : f32 to vector<16x1xf32>
    %8 = arith.maximumf %6, %7 : vector<16x1xf32>
    %9 = vector.extract_strided_slice %5 {offsets = [0, 0], sizes = [16, 32], strides = [1, 1]} : vector<16x33xf32> to vector<16x32xf32>
    %10 = tpu.reciprocal %8 : vector<16x1xf32> -> vector<16x1xf32>
    %11 = vector.broadcast %10 : vector<16x1xf32> to vector<16x32xf32>
    %12 = arith.mulf %9, %11 : vector<16x32xf32>
    %c0_6 = arith.constant 0 : index
    %c0_7 = arith.constant 0 : index
    %c0_8 = arith.constant 0 : index
    %13 = vector.load %arg4[%c0_6, %c0_7, %c0_8] : memref<1x16x8xbf16, #tpu.memory_space<vmem>>, vector<1x16x8xbf16>
    %14 = vector.shape_cast %13 : vector<1x16x8xbf16> to vector<16x8xbf16>
    %c0_9 = arith.constant 0 : index
    %c0_10 = arith.constant 0 : index
    %15 = vector.load %arg5[%c0_9, %c0_10] : memref<8x32xbf16, #tpu.memory_space<vmem>>, vector<8x32xbf16>
    %cst_11 = arith.constant dense<0.000000e+00> : vector<16x32xf32>
    %16 = tpu.matmul %14, %15, %cst_11 {dimension_numbers = #tpu.dot_dimension_numbers<[1], [0], [0], [1], [0, 0, 1, 1], [], []>} : vector<16x8xbf16>, vector<8x32xbf16>, vector<16x32xf32> -> vector<16x32xf32>
    %17 = arith.addf %12, %16 : vector<16x32xf32>
    %c0_12 = arith.constant 0 : index
    %c0_13 = arith.constant 0 : index
    %18 = vector.load %arg6[%c0_12, %c0_13] : memref<1x32xf32, #tpu.memory_space<vmem>>, vector<1x32xf32>
    %19 = vector.broadcast %18 : vector<1x32xf32> to vector<16x32xf32>
    %20 = arith.addf %17, %19 : vector<16x32xf32>
    %c0_14 = arith.constant 0 : index
    %c0_15 = arith.constant 0 : index
    %c0_16 = arith.constant 0 : index
    %21 = vector.load %arg7[%c0_14, %c0_15, %c0_16] : memref<1x16x32xf32, #tpu.memory_space<vmem>>, vector<1x16x32xf32>
    %22 = vector.shape_cast %21 : vector<1x16x32xf32> to vector<16x32xf32>
    %23 = vector.shape_cast %20 : vector<16x32xf32> to vector<1x16x32xf32>
    tpu.vector_store %arg7[%c0_14, %c0_15, %c0_16], %23 {strides = array<i32>} : memref<1x16x32xf32, #tpu.memory_space<vmem>>, vector<1x16x32xf32>,
    return
  }
  func.func @transform_0(%arg0: i32, %arg1: i32) -> (i32, i32, i32) {
    %c0_i32 = arith.constant 0 : i32
    %c0_i32_0 = arith.constant 0 : i32
    %c0_i32_1 = arith.constant 0 : i32
    return %arg1, %c0_i32, %c0_i32_0 : i32, i32, i32
  }
  func.func @transform_1(%arg0: i32, %arg1: i32) -> (i32, i32, i32) {
    %c0_i32 = arith.constant 0 : i32
    %c0_i32_0 = arith.constant 0 : i32
    return %arg1, %arg0, %c0_i32 : i32, i32, i32
  }
  func.func @transform_2(%arg0: i32, %arg1: i32) -> (i32, i32, i32) {
    %c0_i32 = arith.constant 0 : i32
    %c0_i32_0 = arith.constant 0 : i32
    return %arg1, %arg0, %c0_i32 : i32, i32, i32
  }
  func.func @transform_3(%arg0: i32, %arg1: i32) -> (i32, i32) {
    %c0_i32 = arith.constant 0 : i32
    %c0_i32_0 = arith.constant 0 : i32
    %c0_i32_1 = arith.constant 0 : i32
    return %c0_i32, %c0_i32_0 : i32, i32
  }
  func.func @transform_4(%arg0: i32, %arg1: i32) -> (i32, i32) {
    %c0_i32 = arith.constant 0 : i32
    %c0_i32_0 = arith.constant 0 : i32
    %c0_i32_1 = arith.constant 0 : i32
    return %c0_i32, %c0_i32_0 : i32, i32
  }
  func.func @transform_5(%arg0: i32, %arg1: i32) -> (i32, i32, i32) {
    %c0_i32 = arith.constant 0 : i32
    %c0_i32_0 = arith.constant 0 : i32
    return %arg1, %arg0, %c0_i32 : i32, i32, i32
  }
}

</mosaic_0001>

<bundles_post_ra>
// kernel: tpu_custom_call.1
= control target key start
LH: loop header
LB: loop body
LE: loop exit
PB: predicated region body
PF: predicated region fallthrough
CT: control target
= control target key end

     0   :  { %10 = vsyncpa [#allocation3], 0  ;;  %s952_s0 = inlined_call_operand.vmem [shape: bf16[2,16,33], index: 0, kind: input, shape index: {}]   ;;  %s953_s1 = inlined_call_operand.vmem [shape: s8[2,16,16], index: 1, kind: input, shape index: {}]   ;;  %s954_s2 = inlined_call_operand.vmem [shape: bf16[2,16,8], index: 2, kind: input, shape index: {}]   ;;  %s955_s3 = inlined_call_operand.hbm [shape: bf16[8,32], index: 3, kind: input, shape index: {}]   ;;  %s956_s4 = inlined_call_operand.vmem [shape: f32[1,32], index: 4, kind: input, shape index: {}]   ;;  %s957_s5 = inlined_call_operand.hbm [shape: f32[2,16,32], index: 5, kind: output, shape index: {}]  }
   0x1   :  { %11 = vsyncpa [#allocation4], 0 }
   0x2   :  { %13 = vsyncpa [#allocation4 + $0x1], 0  ;;  %s843_s18 = smov 0   ;;  %s845_s19 = smov 0  }
   0x3   :  { %s847_s20 = smov 0   ;;  %s849_s21 = smov 0  }
   0x4   :  { %s851_s22 = smov 0   ;;  %s853_s23 = smov 0  }
   0x5 LB: > { %s581_s24 = sadd.s32 4294967295, %s807_s23   ;;  %s582_s25 = sadd.s32 4294967294, %s807_s23   ;;  %s807_s23 = sphi %s853_s23, %s19_s23   ;;  %s803_s22 = sphi %s851_s22, %s964_s22   ;;  %s799_s21 = sphi %s849_s21, %s963_s21   ;;  %s795_s20 = sphi %s847_s20, %s962_s20   ;;  %s791_s19 = sphi %s845_s19, %s961_s19   ;;  %s787_s18 = sphi %s843_s18, %s960_s18  }
   0x6   : > { %s28_s26 = sadd.s32 1, %s803_s22  ;;  %s164_s27 = sadd.s32 1, %s795_s20 }
   0x7   : > { %p29_p0 = scmp.ge.s32.totalorder %s28_s26, 2  ;;  %p174_p1 = scmp.ne.s32.totalorder %s795_s20, %s791_s19 }
   0x8   : > { %p175_p2 = scmp.eq.s32.totalorder %s581_s24, 1  ;;  %p180_p3 = scmp.ne.s32.totalorder %s791_s19, %s787_s18 }
   0x9   : > { %s966_s26 = smov (%p29_p0, %s28_s26), 0  ;;  %p181_p5 = scmp.eq.s32.totalorder %s582_s25, 1 }
   0xa   : > { %p883_p4 = por %p175_p2, %p174_p1  ;;  %s159_s29 = ssub.s32 %s803_s22, %s966_s26 }
   0xb   : > { %p583_p6 = scmp.ge.s32.totalorder %s807_s23, 1  ;;  %p162_p7 = scmp.eq.s32.totalorder %s159_s29, 0 }
   0xc   : > { %p890_p8 = por %p181_p5, %p180_p3  ;;  %p188_p9 = scmp.lt.s32.totalorder %s807_s23, 3 }
   0xd   : > { %s896_s6 = scalar_select %p162_p7, %s795_s20, %s164_s27  }
   0xe   : > { %p189_p10 = pnand %p583_p6, %p188_p9  ;;  %p634_p11 = scmp.eq.s32.totalorder %s581_s24, 0 }
   0xf   : > { %s200_s9 = sshll.u32 %s955_s3, 4  ;;  %s809_s10 = smov [#allocation2]   ;;  %s201_s9 = int_to_ptr.hbm [resolvable:$true] %s200_s9 }
  0x10   : > { %p626_p12 = pneg %p189_p10  ;;  %s202_s11 = sshll.u32 %s809_s10, 4  ;;  %s203_s11 = int_to_ptr.vmem [resolvable:$true] %s202_s11 }
  0x11   : > { %252 = sbr.rel (%p189_p10) target bundleno = 315 (0x13b), region = 40 }
  0x12   : > { %p627_p13 = pnand %p634_p11, %p626_p12 }
  0x14   : > { %629 = dma.hbm_to_vmem [thread:$0]  (!%p627_p13), %s201_s9, 64, %s203_s11, [#allocation3]  }
  0x16   : > { %778 = dma.done.wait (%p634_p11), [#allocation3], 64  }
  0x17   : > { %780 = vsyncadd (%p634_p11), [#allocation3], 4294967232  ;;  %p299_p0 = scmp.lt.s32.totalorder %s799_s21, 1  ;;  %vm341_vm0 = vcmask 130048   ;;  %v403_v7 = vld [vmem:[#allocation2] sm:$0xf] }
  0x18   : > { %vm413_vm1 = vcmask 1043456   ;;  %vm409_vm2 = vcmask 64512   ;;  %v810_v10 = vmov 32   ;;  %s296_s9 = sand.u32 1, %s791_s19   ;;  %v690_v37 = vld [vmem:[%s956_s4] ss:$0 sm:$0xff] }
  0x19   : > { %s300_s12 = scalar_select %p299_p0, %s799_s21, 1  ;;  %v415_v8 = vsel %vm413_vm1, %v403_v7, 0  ;;  %689 = vset.pattern.permute.xlu0 %v810_v10  ;;  %vm439_vm11 = vcmask 261120  }
  0x1a   : > { %424 = vmatpush.bf16.msra.mxu1 %v415_v8  ;;  %s588_s10 = sshll.u32 %s296_s9, 4 }
  0x1b   : > { %s610_s13 = sshll.u32 %s300_s12, 3  ;;  %s611_s14 = sshll.u32 %s300_s12, 2 }
  0x1c   : > { %s303_s17 = scalar_lea.vmem %s952_s0, %s610_s13  ;;  %s312_s27 = scalar_lea.vmem %s953_s1, %s611_s14 }
  0x1d   : > { %v613_v0 = vld [vmem:[%s303_s17] sm:$0xff]  ;;  %s322_s8 = scalar_lea.vmem %s954_s2, %s610_s13  ;;  %s615_s13 = sshll.u32 %s799_s21, 4 }
  0x1e   : > { %v617_v1 = vld [vmem:[%s312_s27] sm:$0xf]   ;;  %352 = vmatpush.bf16.msra.mxu0 %v613_v0  ;;  %s456_s16 = scalar_lea.hbm %s957_s5, %s615_s13  ;;  %s298_s17 = scalar_lea.vmem [#allocation5], %s588_s10 }
  0x1f   : > { %v618_v2 = vunpack.c.0.s8 %v617_v1  ;;  %v619_v3 = vunpack.c.1.s8 %v617_v1  ;;  %v614_v9 = vld [vmem:[%s322_s8] sm:$0xff]  ;;  %s457_s24 = sshll.u32 %s298_s17, 4  ;;  %s459_s25 = sshll.u32 %s456_s16, 4  ;;  %s458_s24 = int_to_ptr.vmem [resolvable:$true] %s457_s24  ;;  %s460_s25 = int_to_ptr.hbm [resolvable:$true] %s459_s25 }
  0x20   : > { %604 = vmatmul.msk.bf16.vlgmr.msra.gmra.mxu1 %vm409_vm2, %v614_v9  ;;  %s443_s21 = scalar_lea.sflag [#allocation4], %s296_s9  ;;  %s739_s27 = sshra.s32 %s460_s25, 4  ;;  %s740_s27 = int_to_ptr.hbm [resolvable:$true] %s739_s27 }
  0x21   : > { %v330_v4 = vcvt.s32.f32 %v618_v2  ;;  %v331_v5 = vcvt.s32.f32 %v619_v3  ;;  %s741_s29 = scalar_lea.hbm %s740_s27, 16  ;;  %s745_s10 = scalar_lea.hbm %s957_s5, 32 }
  0x22   : > { %p742_p1 = scmp.ne.s32.totalorder %s740_s27, %s741_s29  ;;  %p746_p5 = scmp.lt.s32.totalorder %s740_s27, %s957_s5 }
  0x23   : > { %v332_v6 = vpack.c.bf16 %v331_v5, %v330_v4  ;;  %p747_p6 = scmp.lt.s32.totalorder %s745_s10, %s741_s29 }
  0x24   : > { %p743_p2 = pnand %p742_p1, %p883_p4 }
  0x25   : > { %599 = vmatmul.msk.bf16.vlgmr.msra.gmra.mxu0 %vm341_vm0, %v332_v6  ;;  %p748_p7 = por %p747_p6, %p746_p5 }
  0x26   : > { %p744_p3 = pneg %p743_p2 }
  0x28   : > { %p749_p9 = pnand %p748_p7, %p744_p3 }
  0x9d   : > { %v426_v35 = vpop.f32.mrf.mxu1 }
  0xa2   : > { %v354_v11 = vpop.f32.mrf.mxu0 }
  0xa3   : > { %v359_v12 = vmax.f32 %v354_v11, 1.0 }
  0xa5   : > { %691 = vrcp.f32 %v359_v12  ;;  %v372_v18 = vand.u32 2147483648, %v359_v12  ;;  %v370_v20 = vand.u32 2147483647, %v359_v12  ;;  %vm366_vm4 = vweird.f32 %v359_v12  ;;  %v428_v43 = vpop.f32.mrf.mxu1 }
  0xa7   : > { %v373_v23 = vor.u32 1.1754944e-38, %v372_v18  ;;  %vm371_vm6 = vcmp.eq.f32.partialorder %v370_v20, 8.507059e+37 }
  0xaa   : > { %v356_v13 = vpop.f32.mrf.mxu0 }
  0xab   : > { %v692_v14 = vpop.eup %691  ;;  %v360_v15 = vmax.f32 %v356_v13, 1.0 }
  0xac   : > { %v362_v16 = vmul.f32 %v692_v14, %v359_v12  ;;  %vm367_vm3 = vweird.f32 %v692_v14 }
  0xad   : > { %693 = vrcp.f32 %v360_v15  ;;  %vm368_vm5 = vmor %vm366_vm4, %vm367_vm3  ;;  %v386_v28 = vand.u32 2147483648, %v360_v15  ;;  %v384_v30 = vand.u32 2147483647, %v360_v15  ;;  %vm380_vm8 = vweird.f32 %v360_v15 }
  0xae   : > { %v363_v17 = vsub.f32 1.0, %v362_v16 }
  0xaf   : > { %v387_v32 = vor.u32 1.1754944e-38, %v386_v28  ;;  %vm385_vm10 = vcmp.eq.f32.partialorder %v384_v30, 8.507059e+37 }
  0xb0   : > { %v364_v19 = vmul.f32 %v692_v14, %v363_v17 }
  0xb2   : > { %v365_v21 = vadd.f32 %v692_v14, %v364_v19 }
  0xb3   : > { %v694_v22 = vpop.eup %693 }
  0xb4   : > { %v369_v24 = vsel %vm368_vm5, %v692_v14, %v365_v21  ;;  %v376_v25 = vmul.f32 %v694_v22, %v360_v15  ;;  %vm381_vm7 = vweird.f32 %v694_v22 }
  0xb5   : > { %v374_v26 = vsel %vm371_vm6, %v373_v23, %v369_v24  ;;  %vm382_vm9 = vmor %vm380_vm8, %vm381_vm7 }
  0xb6   : > { %391 = vperm.xlu0 %689, %v374_v26   ;;  %v377_v27 = vsub.f32 1.0, %v376_v25 }
  0xb8   : > { %v378_v29 = vmul.f32 %v694_v22, %v377_v27 }
  0xba   : > { %v379_v31 = vadd.f32 %v694_v22, %v378_v29 }
  0xbc   : > { %v383_v33 = vsel %vm382_vm9, %v694_v22, %v379_v31 }
  0xbd   : > { %v388_v34 = vsel %vm385_vm10, %v387_v32, %v383_v33 }
  0xbe   : > { %396 = vperm.xlu0 %689, %v388_v34  }
 0x128   : > { %v392_v36 = vpop.permute.xlu0 %391 }
 0x129   : > { %v399_v38 = vmul.f32 %v392_v36, %v354_v11 }
 0x12b   : > { %v431_v39 = vadd.f32 %v426_v35, %v399_v38 }
 0x12d   : > { %v437_v40 = vadd.f32 %v690_v37, %v431_v39 }
 0x12f   : > { %440 = vst.msk [vmem:[%s298_s17] sm:$0xff] %vm439_vm11, %v437_v40 }
 0x130   : > { %v397_v41 = vpop.permute.xlu0 %396 }
 0x131   : > { %v400_v42 = vmul.f32 %v397_v41, %v356_v13 }
 0x133   : > { %v432_v44 = vadd.f32 %v428_v43, %v400_v42 }
 0x135   : > { %v438_v45 = vadd.f32 %v690_v37, %v432_v44 }
 0x137   : > { %441 = vst.msk [vmem:[%s298_s17 + $0x8] sm:$0xff] %vm439_vm11, %v438_v45 }
 0x138   : > { %752 = shalt.err (!%p749_p9)
}
 0x139   : > { %s811_s9 = smov 128   ;;  %s812_s13 = smov 8  }
 0x13a   : > { %624 = dma.vmem_to_hbm [thread:$0]  (%p883_p4), %s458_s24, 256, %s460_s25, %s443_s21, %s811_s9, %s811_s9, %s812_s13  }
 0x13b PF: > { %p636_p10 = scmp.ge.s32.totalorder %s807_s23, 2  ;;  %s474_s14 = sand.u32 1, %s787_s18  }
 0x13c   : > { %s475_s15 = scalar_lea.sflag [#allocation4], %s474_s14 }
 0x13d   : > { %p631_p11 = pnand %p636_p10, %p890_p8 }
 0x13f   : > { %p632_p12 = pneg %p631_p11 }
 0x141   : > { %782 = dma.done.wait (%p632_p12), %s475_s15, 256  }
 0x142   : > { %784 = vsyncadd (%p632_p12), %s475_s15, 4294967040  ;;  %s19_s23 = sadd.s32 1, %s807_s23   ;;  %s960_s18 = smov %s791_s19 }
 0x143   : > { %p16_p13 = scmp.ge.s32.totalorder %s19_s23, 4   ;;  %s961_s19 = smov %s795_s20 }
 0x144   : > { %s962_s20 = smov %s896_s6  ;;  %s963_s21 = smov %s803_s22 }
 0x145   : > { %s964_s22 = smov %s966_s26  ;;  %18 = sbr.rel (!%p16_p13) target bundleno = 5 (0x5), region = 86 }
 0x14a   :  { %481 = vsyncpa [#allocation3], 1 }
 0x14b   :  { %483 = vsyncpa [#allocation3 + $0x1], 1 }
 0x14c   :  { %484 = vsyncpa [#allocation4], 1 }
 0x14d   :  { %486 = vsyncpa [#allocation4 + $0x1], 1 }

</bundles_post_ra>
